<compile_context>
chip_gen: v6e
topology: v6e:2x2x1
jax: 0.10.0
libtpu: 0.0.40
codegen_flags: <defaults>
</compile_context>

<pallas_src>
import functools

import jax
import jax.numpy as jnp
from jax.experimental import pallas as pl
from jax.experimental.pallas import tpu as pltpu

LANE = 128
SUB_BF16 = 16   # bf16 sublane packing

NODE_TYPES = ["glomeruli", "macrophage"]
# fixed edge-type order shared by the host-side edge slab and the kernel
EDGE_TYPES = [("glomeruli", "glomeruli"), ("macrophage", "glomeruli"),
              ("glomeruli", "macrophage"), ("macrophage", "macrophage")]


def _round_up(x, m):
    return ((x + m - 1) // m) * m


# ----------------------------------------------------------------------------- fused kernel

def _fused_hetero_gnn_kernel(xg_ref, xc_ref, e_ref, w_ref, b_ref, o_ref, *,
                             hidden, n_mp, n_glom, n_cell):
    f32, bf16 = jnp.float32, jnp.bfloat16
    H = hidden
    kmax = w_ref.shape[1]

    def relu(v):
        return jnp.maximum(v, 0.0)

    def pad_lanes(v, width):
        if v.shape[1] == width:
            return v
        return jnp.concatenate(
            [v, jnp.zeros((v.shape[0], width - v.shape[1]), v.dtype)], axis=1)

    b = b_ref[...]                       # [8, 128] f32 bias slab (one vreg)
    e = e_ref[...]                       # [2*n_edge_types, E] int32 edge slab
    n_e = e.shape[1]

    # ---- in-kernel dense mean adjacency (replaces the old host-side XLA prologue) ----
    # A_norm[d, s] = (#edges s->d) / max(1, in_degree_et(d));  one-hot-iota matmul.
    # Padding edges use index -1 and never match an iota entry -> contribute nothing.
    def mean_adj(k, n_src, n_dst):
        src = e[2 * k + 0: 2 * k + 1, :]                                   # [1, E]
        dst = e[2 * k + 1: 2 * k + 2, :]                                   # [1, E]
        oh_dst_t = (jax.lax.broadcasted_iota(jnp.int32, (n_dst, n_e), 0) == dst).astype(f32)
        oh_src_t = (jax.lax.broadcasted_iota(jnp.int32, (n_src, n_e), 0) == src).astype(f32)
        cnt = jax.lax.dot_general(oh_dst_t, oh_src_t,
                                  dimension_numbers=(((1,), (1,)), ((), ())),
                                  preferred_element_type=f32)              # [n_dst, n_src]
        deg = jnp.sum(cnt, axis=1, keepdims=True)
        return cnt / jnp.maximum(deg, 1.0)

    # kept in f32 for parity with the PyTorch reference (cost negligible at these sizes)
    a_g = jnp.concatenate([mean_adj(0, n_glom, n_glom),
                           mean_adj(1, n_cell, n_glom)], axis=1)           # [N_g, N_g+N_c]
    a_c = jnp.concatenate([mean_adj(2, n_glom, n_cell),
                           mean_adj(3, n_cell, n_cell)], axis=1)           # [N_c, N_g+N_c]

    # ---- per-node-type input projection + ReLU (dropout == identity in eval) ----
    xg = pad_lanes(xg_ref[...].astype(bf16), kmax)
    xc = pad_lanes(xc_ref[...].astype(bf16), kmax)
    hg = relu(jnp.dot(xg, w_ref[0], preferred_element_type=f32)[:, :H] + b[0:1, :H])
    hc = relu(jnp.dot(xc, w_ref[1], preferred_element_type=f32)[:, :H] + b[1:2, :H])

    # ---- message passing: ONE lane-packed 128-wide dot per source node type per layer ----
    #   w_ref[2+2l] = [Wl(g->g) | Wl(g->c) | Wr_g_folded]   (lanes 0:H, H:2H, 2H:3H)
    #   w_ref[3+2l] = [Wl(c->g) | Wl(c->c) | Wr_c_folded]
    for l in range(n_mp):                                 # static unroll (n_mp == 2)
        rg = jnp.dot(hg.astype(bf16), w_ref[2 + 2 * l], preferred_element_type=f32)  # [N_g,128]
        rc = jnp.dot(hc.astype(bf16), w_ref[3 + 2 * l], preferred_element_type=f32)  # [N_c,128]

        # merged mean-aggregation per destination:  [A_g->d | A_c->d] @ [[t_g],[t_c]]
        p_g = jnp.concatenate([rg[:, 0:H], rc[:, 0:H]], axis=0)            # [N_g+N_c, H]
        p_c = jnp.concatenate([rg[:, H:2 * H], rc[:, H:2 * H]], axis=0)

        out_g = (jnp.dot(a_g, p_g, preferred_element_type=f32)
                 + rg[:, 2 * H:3 * H]                                      # h_g @ Wr_folded
                 + b[2 + 2 * l: 3 + 2 * l, :H])                            # folded bias
        out_c = (jnp.dot(a_c, p_c, preferred_element_type=f32)
                 + rc[:, 2 * H:3 * H]
                 + b[3 + 2 * l: 4 + 2 * l, :H])

        hg = relu(out_g)            # HeteroConv aggr='sum' -> Identity norm -> ReLU
        hc = relu(out_c)

    # ---- readout on glomeruli + row softmax (128-lane logits; padded bias = -inf) ----
    y = (jnp.dot(hg.astype(bf16), w_ref[2 + 2 * n_mp], preferred_element_type=f32)
         + b[2 + 2 * n_mp: 3 + 2 * n_mp, :])
    m = jnp.max(y, axis=1, keepdims=True)
    ex = jnp.exp(y - m)
    # exact reciprocal keeps row-sums == 1 within 1e-5
    o_ref[...] = ex * pl.reciprocal(jnp.sum(ex, axis=1, keepdims=True), approx=False)


# ----------------------------------------------------------------------------- param packing

def pack_params(params):
    """Pack every weight/bias into two slabs.  Run ONCE, outside the per-call path.

    w_slab (bf16) [2 + 2*n_mp + 1, Kmax, 128]:
      block 0 / 1       : input projections (rows 0:F_in, lanes 0:H)
      block 2+2l / 3+2l : per-layer lane-packed source blocks
                          [Wl(src->glom) | Wl(src->cell) | Wr_folded(src-as-dst)]
      block 2+2*n_mp    : readout weight (lanes 0:out_dim)
    b_slab (f32) [8, 128]:
      row 0 / 1         : input-projection biases
      row 2+2l / 3+2l   : folded per-destination message-passing biases
      row 2+2*n_mp      : readout bias, -inf in padded lanes (softmax ignores them)
    """
    g, c = NODE_TYPES
    hidden = params["in_proj"][g]["w_t"].shape[1]
    out_dim = params["out"]["w_t"].shape[1]
    n_mp = len(params["mp_layers"])
    f_g = params["in_proj"][g]["w_t"].shape[0]
    f_c = params["in_proj"][c]["w_t"].shape[0]
    assert 3 * hidden <= LANE, "lane-packed MP weights assume 3*hidden <= 128"
    assert out_dim <= LANE
    kmax = _round_up(max(f_g, f_c, hidden), SUB_BF16)
    n_blocks = 2 + 2 * n_mp + 1

    w = jnp.zeros((n_blocks, kmax, LANE), jnp.float32)
    w = w.at[0, :f_g, :hidden].set(params["in_proj"][g]["w_t"])
    w = w.at[1, :f_c, :hidden].set(params["in_proj"][c]["w_t"])

    b = jnp.zeros((_round_up(n_blocks, 8), LANE), jnp.float32)
    b = b.at[0, :hidden].set(params["in_proj"][g]["b"][0])
    b = b.at[1, :hidden].set(params["in_proj"][c]["b"][0])

    for l, layer in enumerate(params["mp_layers"]):
        # folded dst-side lin_r weights / biases:  xd@Wr1 + xd@Wr2 == xd@(Wr1+Wr2)
        wr_g = layer[(g, g)]["wr_t"] + layer[(c, g)]["wr_t"]
        wr_c = layer[(g, c)]["wr_t"] + layer[(c, c)]["wr_t"]
        wg_pack = jnp.concatenate([layer[(g, g)]["wl_t"], layer[(g, c)]["wl_t"], wr_g], axis=1)
        wc_pack = jnp.concatenate([layer[(c, g)]["wl_t"], layer[(c, c)]["wl_t"], wr_c], axis=1)
        w = w.at[2 + 2 * l, :hidden, :3 * hidden].set(wg_pack)
        w = w.at[3 + 2 * l, :hidden, :3 * hidden].set(wc_pack)
        b = b.at[2 + 2 * l, :hidden].set((layer[(g, g)]["bl"] + layer[(c, g)]["bl"])[0])
        b = b.at[3 + 2 * l, :hidden].set((layer[(g, c)]["bl"] + layer[(c, c)]["bl"])[0])

    w = w.at[2 + 2 * n_mp, :hidden, :out_dim].set(params["out"]["w_t"])
    b = b.at[2 + 2 * n_mp, :].set(jnp.full((LANE,), -jnp.inf, jnp.float32))
    b = b.at[2 + 2 * n_mp, :out_dim].set(params["out"]["b"][0])

    return w.astype(jnp.bfloat16), b


# ----------------------------------------------------------------------------- params

def init_params(key, in_dims, hidden, out_dim, n_mp):
    def lin(k, fin, fout):
        kw, kb = jax.random.split(k)
        scale = 1.0 / jnp.sqrt(jnp.float32(fin))
        w = jax.random.uniform(kw, (fout, fin), jnp.float32, -scale, scale)
        b = jax.random.uniform(kb, (fout,), jnp.float32, -scale, scale)
        return w, b

    keys = jax.random.split(key, 64)
    ki = iter(range(64))
    params = {"in_proj": {}, "mp_layers": [], "out": {}}

    # per-node-type input projection (LazyLinear -> hidden)
    for nt in NODE_TYPES:
        w, b = lin(keys[next(ki)], in_dims[nt], hidden)
        params["in_proj"][nt] = {"w_t": w.T, "b": b.reshape(1, -1)}

    # message passing layers: one SAGEConv (lin_l with bias, lin_r without) per edge type
    for _ in range(n_mp):
        layer = {}
        for et in EDGE_TYPES:
            wl, bl = lin(keys[next(ki)], hidden, hidden)
            wr, _ = lin(keys[next(ki)], hidden, hidden)
            layer[et] = {"wl_t": wl.T, "bl": bl.reshape(1, -1), "wr_t": wr.T}
        params["mp_layers"].append(layer)

    # readout (LazyLinear hidden -> out_dim)
    w, b = lin(keys[next(ki)], hidden, out_dim)
    params["out"] = {"w_t": w.T, "b": b.reshape(1, -1)}
    return params


# ----------------------------------------------------------------------------- forward

@functools.partial(jax.jit, static_argnames=("hidden", "out_dim"))
def hetero_gnn_forward(w_slab, b_slab, x_dict, edge_index_dict, *, hidden, out_dim):
    xg = x_dict["glomeruli"]
    xc = x_dict["macrophage"]
    n_glom = xg.shape[0]
    n_cell = xc.shape[0]
    n_mp = (w_slab.shape[0] - 3) // 2

    # single int32 edge slab: rows 2k / 2k+1 = src / dst indices of edge type k (pad = -1)
    e_list = [edge_index_dict[et] for et in EDGE_TYPES]
    e_max = max(int(ei.shape[1]) for ei in e_list)
    e_slab = jnp.concatenate(
        [jnp.pad(ei.astype(jnp.int32), ((0, 0), (0, e_max - ei.shape[1])),
                 constant_values=-1) for ei in e_list], axis=0)

    kernel = functools.partial(_fused_hetero_gnn_kernel, hidden=hidden, n_mp=n_mp,
                               n_glom=n_glom, n_cell=n_cell)
    vmem = pl.BlockSpec(memory_space=pltpu.MemorySpace.VMEM)
    out_padded = pl.pallas_call(
        kernel,
        out_shape=jax.ShapeDtypeStruct((n_glom, LANE), jnp.float32),
        in_specs=[vmem] * 5,
        out_specs=vmem,
    )(xg, xc, e_slab, w_slab, b_slab)

    return out_padded[:, :out_dim]


# ----------------------------------------------------------------------------- main

if __name__ == "__main__":
    key = jax.random.PRNGKey(0)
    k_feat_g, k_feat_c, k_e, k_p = jax.random.split(key, 4)

    N_GLOM, N_CELL = 16, 16
    F_IN = {"glomeruli": 8, "macrophage": 8}
    HIDDEN, OUT_DIM, N_MP, N_EDGES = 32, 4, 2, 32

    x_dict = {
        "glomeruli": jax.random.normal(k_feat_g, (N_GLOM, F_IN["glomeruli"]), jnp.float32),
        "macrophage": jax.random.normal(k_feat_c, (N_CELL, F_IN["macrophage"]), jnp.float32),
    }

    n_nodes = {"glomeruli": N_GLOM, "macrophage": N_CELL}
    edge_keys = jax.random.split(k_e, len(EDGE_TYPES))
    edge_index_dict = {}
    for (src, dst), ek in zip(EDGE_TYPES, edge_keys):
        ks, kd = jax.random.split(ek)
        edge_index_dict[(src, dst)] = jnp.stack([
            jax.random.randint(ks, (N_EDGES,), 0, n_nodes[src]),
            jax.random.randint(kd, (N_EDGES,), 0, n_nodes[dst]),
        ], axis=0)

    params = init_params(k_p, F_IN, HIDDEN, OUT_DIM, N_MP)
    w_slab, b_slab = pack_params(params)          # one-time host-side packing (hoisted)

    out = hetero_gnn_forward(w_slab, b_slab, x_dict, edge_index_dict,
                             hidden=HIDDEN, out_dim=OUT_DIM)
    out = jax.block_until_ready(out)

    assert out.shape == (N_GLOM, OUT_DIM)
    assert bool(jnp.all(jnp.isfinite(out)))
    # rows of a softmax must sum to 1
    assert bool(jnp.allclose(jnp.sum(out, axis=1), 1.0, atol=1e-5))

    print("KERNEL_OK")
</pallas_src>

<mosaic_0001>
module attributes {stable_mosaic.version = 11 : i64} {
  func.func @_fused_hetero_gnn_kernel(%arg0: memref<16x8xf32, #tpu.memory_space<vmem>>, %arg1: memref<16x8xf32, #tpu.memory_space<vmem>>, %arg2: memref<8x32xi32, #tpu.memory_space<vmem>>, %arg3: memref<7x32x128xbf16, #tpu.memory_space<vmem>>, %arg4: memref<8x128xf32, #tpu.memory_space<vmem>>, %arg5: memref<16x128xf32, #tpu.memory_space<vmem>>) attributes {dimension_semantics = [], scalar_prefetch = 0 : i64, scratch_operands = 0 : i64, tpu.core_type = #tpu.core_type<tc>} {
    %c0 = arith.constant 0 : index
    %c0_0 = arith.constant 0 : index
    %0 = vector.load %arg4[%c0, %c0_0] : memref<8x128xf32, #tpu.memory_space<vmem>>, vector<8x128xf32>
    %c0_1 = arith.constant 0 : index
    %c0_2 = arith.constant 0 : index
    %1 = vector.load %arg2[%c0_1, %c0_2] : memref<8x32xi32, #tpu.memory_space<vmem>>, vector<8x32xi32>
    %2 = vector.extract_strided_slice %1 {offsets = [0, 0], sizes = [1, 32], strides = [1, 1]} : vector<8x32xi32> to vector<1x32xi32>
    %3 = vector.extract_strided_slice %1 {offsets = [1, 0], sizes = [1, 32], strides = [1, 1]} : vector<8x32xi32> to vector<1x32xi32>
    %4 = tpu.iota {dimensions = array<i32: 0>} : vector<16x32xi32>
    %5 = vector.broadcast %3 : vector<1x32xi32> to vector<16x32xi32>
    %6 = arith.cmpi eq, %4, %5 : vector<16x32xi32>
    %7 = arith.extui %6 : vector<16x32xi1> to vector<16x32xi32>
    %8 = arith.sitofp %7 : vector<16x32xi32> to vector<16x32xf32>
    %9 = tpu.iota {dimensions = array<i32: 0>} : vector<16x32xi32>
    %10 = vector.broadcast %2 : vector<1x32xi32> to vector<16x32xi32>
    %11 = arith.cmpi eq, %9, %10 : vector<16x32xi32>
    %12 = arith.extui %11 : vector<16x32xi1> to vector<16x32xi32>
    %13 = arith.sitofp %12 : vector<16x32xi32> to vector<16x32xf32>
    %cst = arith.constant dense<0.000000e+00> : vector<16x16xf32>
    %14 = tpu.matmul %8, %13, %cst {dimension_numbers = #tpu.dot_dimension_numbers<[1], [1], [0], [0], [0, 0, 1, 0], [], []>} : vector<16x32xf32>, vector<16x32xf32>, vector<16x16xf32> -> vector<16x16xf32>
    %cst_3 = arith.constant dense<0.000000e+00> : vector<16xf32>
    %15 = vector.multi_reduction <add>, %14, %cst_3 [1] : vector<16x16xf32> to vector<16xf32>
    %16 = vector.shape_cast %15 : vector<16xf32> to vector<16x1xf32>
    %cst_4 = arith.constant 1.000000e+00 : f32
    %17 = vector.broadcast %cst_4 : f32 to vector<16x1xf32>
    %18 = arith.maximumf %16, %17 : vector<16x1xf32>
    %19 = vector.broadcast %18 : vector<16x1xf32> to vector<16x16xf32>
    %20 = arith.divf %14, %19 : vector<16x16xf32>
    %21 = vector.extract_strided_slice %1 {offsets = [2, 0], sizes = [1, 32], strides = [1, 1]} : vector<8x32xi32> to vector<1x32xi32>
    %22 = vector.extract_strided_slice %1 {offsets = [3, 0], sizes = [1, 32], strides = [1, 1]} : vector<8x32xi32> to vector<1x32xi32>
    %23 = tpu.iota {dimensions = array<i32: 0>} : vector<16x32xi32>
    %24 = vector.broadcast %22 : vector<1x32xi32> to vector<16x32xi32>
    %25 = arith.cmpi eq, %23, %24 : vector<16x32xi32>
    %26 = arith.extui %25 : vector<16x32xi1> to vector<16x32xi32>
    %27 = arith.sitofp %26 : vector<16x32xi32> to vector<16x32xf32>
    %28 = tpu.iota {dimensions = array<i32: 0>} : vector<16x32xi32>
    %29 = vector.broadcast %21 : vector<1x32xi32> to vector<16x32xi32>
    %30 = arith.cmpi eq, %28, %29 : vector<16x32xi32>
    %31 = arith.extui %30 : vector<16x32xi1> to vector<16x32xi32>
    %32 = arith.sitofp %31 : vector<16x32xi32> to vector<16x32xf32>
    %cst_5 = arith.constant dense<0.000000e+00> : vector<16x16xf32>
    %33 = tpu.matmul %27, %32, %cst_5 {dimension_numbers = #tpu.dot_dimension_numbers<[1], [1], [0], [0], [0, 0, 1, 0], [], []>} : vector<16x32xf32>, vector<16x32xf32>, vector<16x16xf32> -> vector<16x16xf32>
    %cst_6 = arith.constant dense<0.000000e+00> : vector<16xf32>
    %34 = vector.multi_reduction <add>, %33, %cst_6 [1] : vector<16x16xf32> to vector<16xf32>
    %35 = vector.shape_cast %34 : vector<16xf32> to vector<16x1xf32>
    %cst_7 = arith.constant 1.000000e+00 : f32
    %36 = vector.broadcast %cst_7 : f32 to vector<16x1xf32>
    %37 = arith.maximumf %35, %36 : vector<16x1xf32>
    %38 = vector.broadcast %37 : vector<16x1xf32> to vector<16x16xf32>
    %39 = arith.divf %33, %38 : vector<16x16xf32>
    %40 = tpu.concatenate %20, %39 in 1 : vector<16x16xf32>, vector<16x16xf32> -> vector<16x32xf32>
    %41 = vector.extract_strided_slice %1 {offsets = [4, 0], sizes = [1, 32], strides = [1, 1]} : vector<8x32xi32> to vector<1x32xi32>
    %42 = vector.extract_strided_slice %1 {offsets = [5, 0], sizes = [1, 32], strides = [1, 1]} : vector<8x32xi32> to vector<1x32xi32>
    %43 = tpu.iota {dimensions = array<i32: 0>} : vector<16x32xi32>
    %44 = vector.broadcast %42 : vector<1x32xi32> to vector<16x32xi32>
    %45 = arith.cmpi eq, %43, %44 : vector<16x32xi32>
    %46 = arith.extui %45 : vector<16x32xi1> to vector<16x32xi32>
    %47 = arith.sitofp %46 : vector<16x32xi32> to vector<16x32xf32>
    %48 = tpu.iota {dimensions = array<i32: 0>} : vector<16x32xi32>
    %49 = vector.broadcast %41 : vector<1x32xi32> to vector<16x32xi32>
    %50 = arith.cmpi eq, %48, %49 : vector<16x32xi32>
    %51 = arith.extui %50 : vector<16x32xi1> to vector<16x32xi32>
    %52 = arith.sitofp %51 : vector<16x32xi32> to vector<16x32xf32>
    %cst_8 = arith.constant dense<0.000000e+00> : vector<16x16xf32>
    %53 = tpu.matmul %47, %52, %cst_8 {dimension_numbers = #tpu.dot_dimension_numbers<[1], [1], [0], [0], [0, 0, 1, 0], [], []>} : vector<16x32xf32>, vector<16x32xf32>, vector<16x16xf32> -> vector<16x16xf32>
    %cst_9 = arith.constant dense<0.000000e+00> : vector<16xf32>
    %54 = vector.multi_reduction <add>, %53, %cst_9 [1] : vector<16x16xf32> to vector<16xf32>
    %55 = vector.shape_cast %54 : vector<16xf32> to vector<16x1xf32>
    %cst_10 = arith.constant 1.000000e+00 : f32
    %56 = vector.broadcast %cst_10 : f32 to vector<16x1xf32>
    %57 = arith.maximumf %55, %56 : vector<16x1xf32>
    %58 = vector.broadcast %57 : vector<16x1xf32> to vector<16x16xf32>
    %59 = arith.divf %53, %58 : vector<16x16xf32>
    %60 = vector.extract_strided_slice %1 {offsets = [6, 0], sizes = [1, 32], strides = [1, 1]} : vector<8x32xi32> to vector<1x32xi32>
    %61 = vector.extract_strided_slice %1 {offsets = [7, 0], sizes = [1, 32], strides = [1, 1]} : vector<8x32xi32> to vector<1x32xi32>
    %62 = tpu.iota {dimensions = array<i32: 0>} : vector<16x32xi32>
    %63 = vector.broadcast %61 : vector<1x32xi32> to vector<16x32xi32>
    %64 = arith.cmpi eq, %62, %63 : vector<16x32xi32>
    %65 = arith.extui %64 : vector<16x32xi1> to vector<16x32xi32>
    %66 = arith.sitofp %65 : vector<16x32xi32> to vector<16x32xf32>
    %67 = tpu.iota {dimensions = array<i32: 0>} : vector<16x32xi32>
    %68 = vector.broadcast %60 : vector<1x32xi32> to vector<16x32xi32>
    %69 = arith.cmpi eq, %67, %68 : vector<16x32xi32>
    %70 = arith.extui %69 : vector<16x32xi1> to vector<16x32xi32>
    %71 = arith.sitofp %70 : vector<16x32xi32> to vector<16x32xf32>
    %cst_11 = arith.constant dense<0.000000e+00> : vector<16x16xf32>
    %72 = tpu.matmul %66, %71, %cst_11 {dimension_numbers = #tpu.dot_dimension_numbers<[1], [1], [0], [0], [0, 0, 1, 0], [], []>} : vector<16x32xf32>, vector<16x32xf32>, vector<16x16xf32> -> vector<16x16xf32>
    %cst_12 = arith.constant dense<0.000000e+00> : vector<16xf32>
    %73 = vector.multi_reduction <add>, %72, %cst_12 [1] : vector<16x16xf32> to vector<16xf32>
    %74 = vector.shape_cast %73 : vector<16xf32> to vector<16x1xf32>
    %cst_13 = arith.constant 1.000000e+00 : f32
    %75 = vector.broadcast %cst_13 : f32 to vector<16x1xf32>
    %76 = arith.maximumf %74, %75 : vector<16x1xf32>
    %77 = vector.broadcast %76 : vector<16x1xf32> to vector<16x16xf32>
    %78 = arith.divf %72, %77 : vector<16x16xf32>
    %79 = tpu.concatenate %59, %78 in 1 : vector<16x16xf32>, vector<16x16xf32> -> vector<16x32xf32>
    %c0_14 = arith.constant 0 : index
    %c0_15 = arith.constant 0 : index
    %80 = vector.load %arg0[%c0_14, %c0_15] : memref<16x8xf32, #tpu.memory_space<vmem>>, vector<16x8xf32>
    %81 = arith.truncf %80 : vector<16x8xf32> to vector<16x8xbf16>
    %cst_16 = arith.constant 0.000000e+00 : bf16
    %82 = vector.broadcast %cst_16 : bf16 to vector<16x24xbf16>
    %83 = tpu.concatenate %81, %82 in 1 : vector<16x8xbf16>, vector<16x24xbf16> -> vector<16x32xbf16>
    %c0_17 = arith.constant 0 : index
    %c0_18 = arith.constant 0 : index
    %84 = vector.load %arg1[%c0_17, %c0_18] : memref<16x8xf32, #tpu.memory_space<vmem>>, vector<16x8xf32>
    %85 = arith.truncf %84 : vector<16x8xf32> to vector<16x8xbf16>
    %cst_19 = arith.constant 0.000000e+00 : bf16
    %86 = vector.broadcast %cst_19 : bf16 to vector<16x24xbf16>
    %87 = tpu.concatenate %85, %86 in 1 : vector<16x8xbf16>, vector<16x24xbf16> -> vector<16x32xbf16>
    %c0_20 = arith.constant 0 : index
    %c0_21 = arith.constant 0 : index
    %c0_22 = arith.constant 0 : index
    %88 = vector.load %arg3[%c0_20, %c0_21, %c0_22] : memref<7x32x128xbf16, #tpu.memory_space<vmem>>, vector<1x32x128xbf16>
    %89 = vector.shape_cast %88 : vector<1x32x128xbf16> to vector<32x128xbf16>
    %cst_23 = arith.constant dense<0.000000e+00> : vector<16x128xf32>
    %90 = tpu.matmul %83, %89, %cst_23 {dimension_numbers = #tpu.dot_dimension_numbers<[1], [0], [0], [1], [0, 0, 1, 1], [], []>} : vector<16x32xbf16>, vector<32x128xbf16>, vector<16x128xf32> -> vector<16x128xf32>
    %91 = vector.extract_strided_slice %90 {offsets = [0, 0], sizes = [16, 32], strides = [1, 1]} : vector<16x128xf32> to vector<16x32xf32>
    %92 = vector.extract_strided_slice %0 {offsets = [0, 0], sizes = [1, 32], strides = [1, 1]} : vector<8x128xf32> to vector<1x32xf32>
    %93 = vector.broadcast %92 : vector<1x32xf32> to vector<16x32xf32>
    %94 = arith.addf %91, %93 : vector<16x32xf32>
    %cst_24 = arith.constant 0.000000e+00 : f32
    %95 = vector.broadcast %cst_24 : f32 to vector<16x32xf32>
    %96 = arith.maximumf %94, %95 : vector<16x32xf32>
    %c1 = arith.constant 1 : index
    %c0_25 = arith.constant 0 : index
    %c0_26 = arith.constant 0 : index
    %97 = vector.load %arg3[%c1, %c0_25, %c0_26] : memref<7x32x128xbf16, #tpu.memory_space<vmem>>, vector<1x32x128xbf16>
    %98 = vector.shape_cast %97 : vector<1x32x128xbf16> to vector<32x128xbf16>
    %cst_27 = arith.constant dense<0.000000e+00> : vector<16x128xf32>
    %99 = tpu.matmul %87, %98, %cst_27 {dimension_numbers = #tpu.dot_dimension_numbers<[1], [0], [0], [1], [0, 0, 1, 1], [], []>} : vector<16x32xbf16>, vector<32x128xbf16>, vector<16x128xf32> -> vector<16x128xf32>
    %100 = vector.extract_strided_slice %99 {offsets = [0, 0], sizes = [16, 32], strides = [1, 1]} : vector<16x128xf32> to vector<16x32xf32>
    %101 = vector.extract_strided_slice %0 {offsets = [1, 0], sizes = [1, 32], strides = [1, 1]} : vector<8x128xf32> to vector<1x32xf32>
    %102 = vector.broadcast %101 : vector<1x32xf32> to vector<16x32xf32>
    %103 = arith.addf %100, %102 : vector<16x32xf32>
    %cst_28 = arith.constant 0.000000e+00 : f32
    %104 = vector.broadcast %cst_28 : f32 to vector<16x32xf32>
    %105 = arith.maximumf %103, %104 : vector<16x32xf32>
    %106 = arith.truncf %96 : vector<16x32xf32> to vector<16x32xbf16>
    %c2 = arith.constant 2 : index
    %c0_29 = arith.constant 0 : index
    %c0_30 = arith.constant 0 : index
    %107 = vector.load %arg3[%c2, %c0_29, %c0_30] : memref<7x32x128xbf16, #tpu.memory_space<vmem>>, vector<1x32x128xbf16>
    %108 = vector.shape_cast %107 : vector<1x32x128xbf16> to vector<32x128xbf16>
    %cst_31 = arith.constant dense<0.000000e+00> : vector<16x128xf32>
    %109 = tpu.matmul %106, %108, %cst_31 {dimension_numbers = #tpu.dot_dimension_numbers<[1], [0], [0], [1], [0, 0, 1, 1], [], []>} : vector<16x32xbf16>, vector<32x128xbf16>, vector<16x128xf32> -> vector<16x128xf32>
    %110 = arith.truncf %105 : vector<16x32xf32> to vector<16x32xbf16>
    %c3 = arith.constant 3 : index
    %c0_32 = arith.constant 0 : index
    %c0_33 = arith.constant 0 : index
    %111 = vector.load %arg3[%c3, %c0_32, %c0_33] : memref<7x32x128xbf16, #tpu.memory_space<vmem>>, vector<1x32x128xbf16>
    %112 = vector.shape_cast %111 : vector<1x32x128xbf16> to vector<32x128xbf16>
    %cst_34 = arith.constant dense<0.000000e+00> : vector<16x128xf32>
    %113 = tpu.matmul %110, %112, %cst_34 {dimension_numbers = #tpu.dot_dimension_numbers<[1], [0], [0], [1], [0, 0, 1, 1], [], []>} : vector<16x32xbf16>, vector<32x128xbf16>, vector<16x128xf32> -> vector<16x128xf32>
    %114 = vector.extract_strided_slice %109 {offsets = [0, 0], sizes = [16, 32], strides = [1, 1]} : vector<16x128xf32> to vector<16x32xf32>
    %115 = vector.extract_strided_slice %113 {offsets = [0, 0], sizes = [16, 32], strides = [1, 1]} : vector<16x128xf32> to vector<16x32xf32>
    %116 = tpu.concatenate %114, %115 in 0 : vector<16x32xf32>, vector<16x32xf32> -> vector<32x32xf32>
    %117 = vector.extract_strided_slice %109 {offsets = [0, 32], sizes = [16, 32], strides = [1, 1]} : vector<16x128xf32> to vector<16x32xf32>
    %118 = vector.extract_strided_slice %113 {offsets = [0, 32], sizes = [16, 32], strides = [1, 1]} : vector<16x128xf32> to vector<16x32xf32>
    %119 = tpu.concatenate %117, %118 in 0 : vector<16x32xf32>, vector<16x32xf32> -> vector<32x32xf32>
    %cst_35 = arith.constant dense<0.000000e+00> : vector<16x32xf32>
    %120 = tpu.matmul %40, %116, %cst_35 {dimension_numbers = #tpu.dot_dimension_numbers<[1], [0], [0], [1], [0, 0, 1, 1], [], []>} : vector<16x32xf32>, vector<32x32xf32>, vector<16x32xf32> -> vector<16x32xf32>
    %121 = vector.extract_strided_slice %109 {offsets = [0, 64], sizes = [16, 32], strides = [1, 1]} : vector<16x128xf32> to vector<16x32xf32>
    %122 = arith.addf %120, %121 : vector<16x32xf32>
    %123 = vector.extract_strided_slice %0 {offsets = [2, 0], sizes = [1, 32], strides = [1, 1]} : vector<8x128xf32> to vector<1x32xf32>
    %124 = vector.broadcast %123 : vector<1x32xf32> to vector<16x32xf32>
    %125 = arith.addf %122, %124 : vector<16x32xf32>
    %cst_36 = arith.constant dense<0.000000e+00> : vector<16x32xf32>
    %126 = tpu.matmul %79, %119, %cst_36 {dimension_numbers = #tpu.dot_dimension_numbers<[1], [0], [0], [1], [0, 0, 1, 1], [], []>} : vector<16x32xf32>, vector<32x32xf32>, vector<16x32xf32> -> vector<16x32xf32>
    %127 = vector.extract_strided_slice %113 {offsets = [0, 64], sizes = [16, 32], strides = [1, 1]} : vector<16x128xf32> to vector<16x32xf32>
    %128 = arith.addf %126, %127 : vector<16x32xf32>
    %129 = vector.extract_strided_slice %0 {offsets = [3, 0], sizes = [1, 32], strides = [1, 1]} : vector<8x128xf32> to vector<1x32xf32>
    %130 = vector.broadcast %129 : vector<1x32xf32> to vector<16x32xf32>
    %131 = arith.addf %128, %130 : vector<16x32xf32>
    %cst_37 = arith.constant 0.000000e+00 : f32
    %132 = vector.broadcast %cst_37 : f32 to vector<16x32xf32>
    %133 = arith.maximumf %125, %132 : vector<16x32xf32>
    %cst_38 = arith.constant 0.000000e+00 : f32
    %134 = vector.broadcast %cst_38 : f32 to vector<16x32xf32>
    %135 = arith.maximumf %131, %134 : vector<16x32xf32>
    %136 = arith.truncf %133 : vector<16x32xf32> to vector<16x32xbf16>
    %c4 = arith.constant 4 : index
    %c0_39 = arith.constant 0 : index
    %c0_40 = arith.constant 0 : index
    %137 = vector.load %arg3[%c4, %c0_39, %c0_40] : memref<7x32x128xbf16, #tpu.memory_space<vmem>>, vector<1x32x128xbf16>
    %138 = vector.shape_cast %137 : vector<1x32x128xbf16> to vector<32x128xbf16>
    %cst_41 = arith.constant dense<0.000000e+00> : vector<16x128xf32>
    %139 = tpu.matmul %136, %138, %cst_41 {dimension_numbers = #tpu.dot_dimension_numbers<[1], [0], [0], [1], [0, 0, 1, 1], [], []>} : vector<16x32xbf16>, vector<32x128xbf16>, vector<16x128xf32> -> vector<16x128xf32>
    %140 = arith.truncf %135 : vector<16x32xf32> to vector<16x32xbf16>
    %c5 = arith.constant 5 : index
    %c0_42 = arith.constant 0 : index
    %c0_43 = arith.constant 0 : index
    %141 = vector.load %arg3[%c5, %c0_42, %c0_43] : memref<7x32x128xbf16, #tpu.memory_space<vmem>>, vector<1x32x128xbf16>
    %142 = vector.shape_cast %141 : vector<1x32x128xbf16> to vector<32x128xbf16>
    %cst_44 = arith.constant dense<0.000000e+00> : vector<16x128xf32>
    %143 = tpu.matmul %140, %142, %cst_44 {dimension_numbers = #tpu.dot_dimension_numbers<[1], [0], [0], [1], [0, 0, 1, 1], [], []>} : vector<16x32xbf16>, vector<32x128xbf16>, vector<16x128xf32> -> vector<16x128xf32>
    %144 = vector.extract_strided_slice %139 {offsets = [0, 0], sizes = [16, 32], strides = [1, 1]} : vector<16x128xf32> to vector<16x32xf32>
    %145 = vector.extract_strided_slice %143 {offsets = [0, 0], sizes = [16, 32], strides = [1, 1]} : vector<16x128xf32> to vector<16x32xf32>
    %146 = tpu.concatenate %144, %145 in 0 : vector<16x32xf32>, vector<16x32xf32> -> vector<32x32xf32>
    %cst_45 = arith.constant dense<0.000000e+00> : vector<16x32xf32>
    %147 = tpu.matmul %40, %146, %cst_45 {dimension_numbers = #tpu.dot_dimension_numbers<[1], [0], [0], [1], [0, 0, 1, 1], [], []>} : vector<16x32xf32>, vector<32x32xf32>, vector<16x32xf32> -> vector<16x32xf32>
    %148 = vector.extract_strided_slice %139 {offsets = [0, 64], sizes = [16, 32], strides = [1, 1]} : vector<16x128xf32> to vector<16x32xf32>
    %149 = arith.addf %147, %148 : vector<16x32xf32>
    %150 = vector.extract_strided_slice %0 {offsets = [4, 0], sizes = [1, 32], strides = [1, 1]} : vector<8x128xf32> to vector<1x32xf32>
    %151 = vector.broadcast %150 : vector<1x32xf32> to vector<16x32xf32>
    %152 = arith.addf %149, %151 : vector<16x32xf32>
    %cst_46 = arith.constant 0.000000e+00 : f32
    %153 = vector.broadcast %cst_46 : f32 to vector<16x32xf32>
    %154 = arith.maximumf %152, %153 : vector<16x32xf32>
    %155 = arith.truncf %154 : vector<16x32xf32> to vector<16x32xbf16>
    %c6 = arith.constant 6 : index
    %c0_47 = arith.constant 0 : index
    %c0_48 = arith.constant 0 : index
    %156 = vector.load %arg3[%c6, %c0_47, %c0_48] : memref<7x32x128xbf16, #tpu.memory_space<vmem>>, vector<1x32x128xbf16>
    %157 = vector.shape_cast %156 : vector<1x32x128xbf16> to vector<32x128xbf16>
    %cst_49 = arith.constant dense<0.000000e+00> : vector<16x128xf32>
    %158 = tpu.matmul %155, %157, %cst_49 {dimension_numbers = #tpu.dot_dimension_numbers<[1], [0], [0], [1], [0, 0, 1, 1], [], []>} : vector<16x32xbf16>, vector<32x128xbf16>, vector<16x128xf32> -> vector<16x128xf32>
    %159 = vector.extract_strided_slice %0 {offsets = [6, 0], sizes = [1, 128], strides = [1, 1]} : vector<8x128xf32> to vector<1x128xf32>
    %160 = vector.broadcast %159 : vector<1x128xf32> to vector<16x128xf32>
    %161 = arith.addf %158, %160 : vector<16x128xf32>
    %cst_50 = arith.constant dense<0xFF800000> : vector<16xf32>
    %162 = vector.multi_reduction <maximumf>, %161, %cst_50 [1] : vector<16x128xf32> to vector<16xf32>
    %163 = vector.shape_cast %162 : vector<16xf32> to vector<16x1xf32>
    %164 = vector.broadcast %163 : vector<16x1xf32> to vector<16x128xf32>
    %165 = arith.subf %161, %164 : vector<16x128xf32>
    %166 = math.exp %165 : vector<16x128xf32>
    %cst_51 = arith.constant dense<0.000000e+00> : vector<16xf32>
    %167 = vector.multi_reduction <add>, %166, %cst_51 [1] : vector<16x128xf32> to vector<16xf32>
    %168 = vector.shape_cast %167 : vector<16xf32> to vector<16x1xf32>
    %169 = tpu.reciprocal %168 : vector<16x1xf32> -> vector<16x1xf32>
    %170 = vector.broadcast %169 : vector<16x1xf32> to vector<16x128xf32>
    %171 = arith.mulf %166, %170 : vector<16x128xf32>
    %c0_52 = arith.constant 0 : index
    %c0_53 = arith.constant 0 : index
    %172 = vector.load %arg5[%c0_52, %c0_53] : memref<16x128xf32, #tpu.memory_space<vmem>>, vector<16x128xf32>
    tpu.vector_store %arg5[%c0_52, %c0_53], %171 {strides = array<i32>} : memref<16x128xf32, #tpu.memory_space<vmem>>, vector<16x128xf32>,
    return
  }
}

</mosaic_0001>

<bundles_post_ra>
// kernel: hetero_gnn_forward.1
= control target key start
LH: loop header
LB: loop body
LE: loop exit
PB: predicated region body
PF: predicated region fallthrough
CT: control target
= control target key end

     0   :  { %10 = vsyncpa [#allocation3], 0  ;;  %s1619_s18 = smov [#allocation2]   ;;  %s1873_s0 = inlined_call_operand.vmem [shape: f32[16,8], index: 0, kind: input, shape index: {}]   ;;  %s1874_s1 = inlined_call_operand.vmem [shape: f32[16,8], index: 1, kind: input, shape index: {}]   ;;  %s1875_s2 = inlined_call_operand.vmem [shape: s32[8,32], index: 2, kind: input, shape index: {}]   ;;  %s1876_s3 = inlined_call_operand.hbm [shape: bf16[7,32,128], index: 3, kind: input, shape index: {}]   ;;  %s1877_s4 = inlined_call_operand.vmem [shape: f32[8,128], index: 4, kind: input, shape index: {}]   ;;  %s1878_s5 = inlined_call_operand.vmem [shape: f32[16,128], index: 5, kind: output, shape index: {}]  }
   0x1   :  { %s22_s19 = sshll.u32 %s1619_s18, 4  ;;  %s23_s19 = int_to_ptr.vmem [resolvable:$true] %s22_s19 }
   0x2   :  { %s1605_s20 = scalar_lea.vmem %s23_s19, 1792  ;;  %p1610_p1 = scmp.lt.s32.totalorder %s23_s19, %s23_s19 }
   0x3   :  { %p1606_p0 = scmp.ne.s32.totalorder %s23_s19, %s1605_s20  ;;  %p1611_p2 = scmp.lt.s32.totalorder %s1605_s20, %s1605_s20 }
   0x5   :  { %p1612_p3 = por %p1611_p2, %p1610_p1 }
   0x7   :  { %p1613_p4 = pnand %p1612_p3, %p1606_p0 }
   0x9   :  { %1616 = shalt.err (!%p1613_p4)
}
   0xa   :  { %s1620_s21 = smov 64   ;;  %s1621_s22 = smov 4  }
   0xb   :  { %28 = dma.hbm_to_vmem [thread:$0]  %s1876_s3, 1792, %s23_s19, [#allocation3], %s1620_s21, %s1620_s21, %s1621_s22  }
   0xc   :  { %1617 = dma.done.wait [#allocation3], 1792  }
   0xd   :  { %1618 = vsyncadd [#allocation3], 4294965504  ;;  %v37_v0 = vlaneseq  ;;  %v36_v9 = vld [vmem:[%s1875_s2] sm:$0xff]  ;;  %vm60_vm0 = vcmask 261120   ;;  %v1622_v18 = vmov 0.0   ;;  %v1559_v37 = vld [vmem:[#allocation2 + $0x8] sm:$0xff]  }
   0xe   :  { %v1560_v38 = vld [vmem:[#allocation2 + $0x18] sm:$0xff]   ;;  %v538_v39 = vld [vmem:[%s1873_s0] sm:$0xff]  ;;  %v539_v40 = vld [vmem:[%s1873_s0 + $0x8] sm:$0xff]  ;;  %s1625_s8 = smov 16  }
   0xf   :  { %v1661_v1 = vshrl.u32 %v37_v0, 7  ;;  %v545_v41 = vld [vmem:[%s1874_s1] sm:$0xff]  ;;  %v546_v42 = vld [vmem:[%s1874_s1 + $0x8] sm:$0xff]  ;;  %v1562_v44 = vld [vmem:[#allocation2 + $0x10] sm:$0xff]   ;;  %v540_v45 = vpack.c.bf16 %v539_v40, %v538_v39 }
  0x10   :  { %v1561_v43 = vld [vmem:[#allocation2] sm:$0xff]   ;;  %v547_v46 = vpack.c.bf16 %v546_v42, %v545_v41  ;;  %v1563_v49 = vld [vmem:[#allocation2 + $0x28] sm:$0xff]   ;;  %v1564_v50 = vld [vmem:[#allocation2 + $0x38] sm:$0xff]  }
  0x11   :  { %v52_v2 = vsub.s32 0, %v1661_v1  ;;  %v173_v3 = vsub.s32 2, %v1661_v1  ;;  %v163_v4 = vsub.s32 3, %v1661_v1  ;;  %v42_v5 = vsub.s32 1, %v1661_v1  ;;  %v1565_v51 = vld [vmem:[#allocation2 + $0x20] sm:$0xff]   ;;  %v1566_v52 = vld [vmem:[#allocation2 + $0x30] sm:$0xff]  }
  0x12   :  { %v302_v6 = vsub.s32 4, %v1661_v1  ;;  %v421_v7 = vsub.s32 6, %v1661_v1  ;;  %v1670_v8 = vadd.s32 8, %v1661_v1  ;;  %v411_v10 = vsub.s32 7, %v1661_v1 }
  0x13   :  { %v53_v11 = vrot.slane %v36_v9, %v52_v2  ;;  %v174_v12 = vrot.slane %v36_v9, %v173_v3  ;;  %v164_v13 = vrot.slane %v36_v9, %v163_v4  ;;  %v43_v14 = vrot.slane %v36_v9, %v42_v5 }
  0x14   :  { %v303_v15 = vrot.slane %v36_v9, %v302_v6  ;;  %v422_v16 = vrot.slane %v36_v9, %v421_v7  ;;  %v292_v17 = vsub.s32 5, %v1661_v1  ;;  %v412_v23 = vrot.slane %v36_v9, %v411_v10 }
  0x15   :  { %vm55_vm1 = vcmp.eq.s32.totalorder %v1670_v8, %v53_v11  ;;  %vm176_vm2 = vcmp.eq.s32.totalorder %v1670_v8, %v174_v12  ;;  %vm54_vm3 = vcmp.eq.s32.totalorder %v1661_v1, %v53_v11  ;;  %vm175_vm4 = vcmp.eq.s32.totalorder %v1661_v1, %v174_v12 }
  0x16   :  { %v1324_v19 = vsel %vm55_vm1, 1.0, %v1622_v18  ;;  %v1332_v20 = vsel %vm176_vm2, 1.0, %v1622_v18  ;;  %v1323_v21 = vsel %vm54_vm3, 1.0, %v1622_v18  ;;  %v1331_v22 = vsel %vm175_vm4, 1.0, %v1622_v18 }
  0x17   :  { %1435 = vmatprep.subr.msk.mxu0 %vm60_vm0, %v1324_v19  ;;  %1442 = vmatprep.subr.msk.mxu1 %vm60_vm0, %v1332_v20  ;;  %vm165_vm5 = vcmp.eq.s32.totalorder %v1661_v1, %v164_v13  ;;  %vm44_vm6 = vcmp.eq.s32.totalorder %v1661_v1, %v43_v14  ;;  %vm305_vm7 = vcmp.eq.s32.totalorder %v1670_v8, %v303_v15  ;;  %vm541_vm2 = vcmask 64512  }
  0x18   :  { %1436 = vmatpush3.xpose.msk.msra.mxu0 %vm60_vm0, %v1324_v19  ;;  %1443 = vmatpush3.xpose.msk.msra.mxu1 %vm60_vm0, %v1332_v20  ;;  %v1329_v24 = vsel %vm165_vm5, 1.0, %v1622_v18  ;;  %v1321_v25 = vsel %vm44_vm6, 1.0, %v1622_v18  ;;  %v293_v26 = vrot.slane %v36_v9, %v292_v17  ;;  %vm166_vm8 = vcmp.eq.s32.totalorder %v1670_v8, %v164_v13 }
  0x19   :  { %1437 = vmatprep.subr.msk.mxu0 %vm60_vm0, %v1323_v21  ;;  %1444 = vmatprep.subr.msk.mxu1 %vm60_vm0, %v1331_v22  ;;  %vm424_vm9 = vcmp.eq.s32.totalorder %v1670_v8, %v422_v16  ;;  %vm45_vm10 = vcmp.eq.s32.totalorder %v1670_v8, %v43_v14  ;;  %v1340_v27 = vsel %vm305_vm7, 1.0, %v1622_v18  ;;  %vm304_vm11 = vcmp.eq.s32.totalorder %v1661_v1, %v303_v15 }
  0x1a   :  { %1446 = vmatprep.mubr.msk.f32.mxu1 %vm60_vm0, %v1329_v24  ;;  %1439 = vmatprep.mubr.msk.f32.mxu0 %vm60_vm0, %v1321_v25  ;;  %v1348_v28 = vsel %vm424_vm9, 1.0, %v1622_v18  ;;  %vm423_vm12 = vcmp.eq.s32.totalorder %v1661_v1, %v422_v16  ;;  %v1330_v29 = vsel %vm166_vm8, 1.0, %v1622_v18  ;;  %v1322_v30 = vsel %vm45_vm10, 1.0, %v1622_v18 }
  0x1b   :  { %vm413_vm13 = vcmp.eq.s32.totalorder %v1661_v1, %v412_v23  ;;  %vm294_vm14 = vcmp.eq.s32.totalorder %v1661_v1, %v293_v26  ;;  %v1339_v31 = vsel %vm304_vm11, 1.0, %v1622_v18  ;;  %v1347_v32 = vsel %vm423_vm12, 1.0, %v1622_v18 }
  0x1c   :  { %1438 = vmatpush3.xpose.msk.msra.mxu0 %vm60_vm0, %v1323_v21  ;;  %1445 = vmatpush3.xpose.msk.msra.mxu1 %vm60_vm0, %v1331_v22  ;;  %v1345_v33 = vsel %vm413_vm13, 1.0, %v1622_v18  ;;  %v1337_v34 = vsel %vm294_vm14, 1.0, %v1622_v18  ;;  %vm414_vm15 = vcmp.eq.s32.totalorder %v1670_v8, %v412_v23  ;;  %vm295_vm1 = vcmp.eq.s32.totalorder %v1670_v8, %v293_v26  ;;  %v1799_v8 = vld [vmem:[%s1877_s4] sm:$0xff]  ;;  %s1624_s4 = smov 96  }
  0x1d   :  { %1449 = vmatprep.subr.msk.mxu0 %vm60_vm0, %v1340_v27  ;;  %1456 = vmatprep.subr.msk.mxu1 %vm60_vm0, %v1348_v28  ;;  %v1346_v35 = vsel %vm414_vm15, 1.0, %v1622_v18  ;;  %v1338_v36 = vsel %vm295_vm1, 1.0, %v1622_v18  ;;  %vm1623_vm3 = vmmov 0   ;;  %v544_v47 = vsel %vm541_vm2, %v540_v45, 0 }
  0x1e   :  { %v549_v48 = vsel %vm541_vm2, %v547_v46, 0  ;;  %vm148_vm4 = vcmask 130048   ;;  %v612_v9 = vrot.slane %v1799_v8, %v52_v2  ;;  %v680_v10 = vrot.slane %v1799_v8, %v42_v5 }
  0x1f   :  { %1447 = vmatmul.mubr.msk.f32.vlgmr.msra.gmra.mxu1 %vm60_vm0, %v1330_v29  ;;  %1440 = vmatmul.mubr.msk.f32.vlgmr.msra.gmra.mxu0 %vm60_vm0, %v1322_v30 }
  0x20   :  { %1450 = vmatpush3.xpose.msk.msra.mxu0 %vm60_vm0, %v1340_v27  ;;  %1457 = vmatpush3.xpose.msk.msra.mxu1 %vm60_vm0, %v1348_v28 }
  0x21   :  { %1451 = vmatprep.subr.msk.mxu0 %vm60_vm0, %v1339_v31  ;;  %1458 = vmatprep.subr.msk.mxu1 %vm60_vm0, %v1347_v32 }
  0x22   :  { %1460 = vmatprep.mubr.msk.f32.mxu1 %vm60_vm0, %v1345_v33  ;;  %1453 = vmatprep.mubr.msk.f32.mxu0 %vm60_vm0, %v1337_v34 }
  0x24   :  { %1452 = vmatpush3.xpose.msk.msra.mxu0 %vm60_vm0, %v1339_v31  ;;  %1459 = vmatpush3.xpose.msk.msra.mxu1 %vm60_vm0, %v1347_v32 }
  0x25   :  { %1463 = vmatprep.subr.bf16.mxu0 %v1622_v18  ;;  %1471 = vmatprep.subr.bf16.mxu1 %v1622_v18 }
  0x27   :  { %1461 = vmatmul.mubr.msk.f32.vlgmr.msra.gmra.mxu1 %vm60_vm0, %v1346_v35  ;;  %1454 = vmatmul.mubr.msk.f32.vlgmr.msra.gmra.mxu0 %vm60_vm0, %v1338_v36 }
  0x28   :  { %1464 = vmatpush3.bf16.msra.mxu0 %v1559_v37  ;;  %1472 = vmatpush3.bf16.msra.mxu1 %v1560_v38 }
  0x29   :  { %1465 = vmatprep.subr.bf16.mxu0 %v1622_v18  ;;  %1473 = vmatprep.subr.bf16.mxu1 %v1622_v18 }
  0x2a   :  { %1467 = vmatprep.mubr.msk.bf16.mxu0 %vm1623_vm3, %v1622_v18  ;;  %1475 = vmatprep.mubr.msk.bf16.mxu1 %vm1623_vm3, %v1622_v18 }
  0x2c   :  { %1466 = vmatpush3.bf16.msra.mxu0 %v1561_v43  ;;  %1474 = vmatpush3.bf16.msra.mxu1 %v1562_v44 }
  0x2d   :  { %1479 = vmatprep.subr.bf16.mxu0 %v1622_v18  ;;  %1487 = vmatprep.subr.bf16.mxu1 %v1622_v18 }
  0x2f   :  { %1468 = vmatmul.mubr.msk.bf16.vlgmr.msra.gmra.mxu0 %vm60_vm0, %v544_v47  ;;  %1476 = vmatmul.mubr.msk.bf16.vlgmr.msra.gmra.mxu1 %vm60_vm0, %v549_v48 }
  0x30   :  { %1483 = vmatprep.mubr.msk.bf16.mxu0 %vm1623_vm3, %v1622_v18  ;;  %1491 = vmatprep.mubr.msk.bf16.mxu1 %vm1623_vm3, %v1622_v18 }
  0x31   :  { %1480 = vmatpush3.bf16.msra.mxu0 %v1563_v49  ;;  %1488 = vmatpush3.bf16.msra.mxu1 %v1564_v50 }
  0x32   :  { %1481 = vmatprep.subr.bf16.mxu0 %v1622_v18  ;;  %1489 = vmatprep.subr.bf16.mxu1 %v1622_v18 }
  0x35   :  { %1482 = vmatpush3.bf16.msra.mxu0 %v1565_v51  ;;  %1490 = vmatpush3.bf16.msra.mxu1 %v1566_v52 }
  0xdf   :  { %v1775_v53 = vpop.f32.mrf.mxu1  ;;  %v1779_v55 = vpop.f32.mrf.mxu0 }
  0xe0   :  { %v271_v58 = vsel %vm148_vm4, %v1775_v53, 0.0  ;;  %v152_v12 = vsel %vm148_vm4, %v1779_v55, 0.0 }
  0xe1   :  { %v1777_v54 = vpop.f32.mrf.mxu1  ;;  %v1783_v57 = vpop.f32.mrf.mxu0 }
  0xe2   :  { %v268_v56 = vsel %vm148_vm4, %v1777_v54, 0.0  ;;  %v149_v2 = vsel %vm148_vm4, %v1783_v57, 0.0 }
  0xe3   :  { %269 = vadd.xlane.f32.xlu1 %v268_v56 }
  0xe7   :  { %v1787_v59 = vpop.f32.mrf.mxu1  ;;  %272 = vadd.xlane.f32.xlu1 %v271_v58  ;;  %v1789_v60 = vpop.f32.mrf.mxu0 }
  0xe8   :  { %v400_v61 = vsel %vm148_vm4, %v1789_v60, 0.0  ;;  %v519_v11 = vsel %vm148_vm4, %v1787_v59, 0.0 }
  0xe9   :  { %v507_v62 = vpop.f32.mrf.mxu1  ;;  %v1794_v0 = vpop.f32.mrf.mxu0 }
  0xea   :  { %v516_v63 = vsel %vm148_vm4, %v507_v62, 0.0  ;;  %v397_v29 = vsel %vm148_vm4, %v1794_v0, 0.0 }
  0xeb   :  { %517 = vadd.xlane.f32.xlu0 %v516_v63  ;;  %401 = vadd.xlane.f32.xlu1 %v400_v61 }
  0xef   :  { %v670_v13 = vpop.f32.mrf.mxu1  ;;  %520 = vadd.xlane.f32.xlu0 %v519_v11  ;;  %153 = vadd.xlane.f32.xlu1 %v152_v12  ;;  %v602_v14 = vpop.f32.mrf.mxu0 }
  0xf0   :  { %v613_v15 = vadd.f32 %v612_v9, %v602_v14  ;;  %v681_v19 = vadd.f32 %v680_v10, %v670_v13 }
  0xf1   :  { %v1469_v16 = vpop.f32.mrf.mxu0  ;;  %v1477_v17 = vpop.f32.mrf.mxu1 }
  0xf2   :  { %v615_v5 = vmax.f32 %v613_v15, 0.0  ;;  %v683_v26 = vmax.f32 %v681_v19, 0.0 }
  0xf3   :  { %v605_v20 = vpop.f32.mrf.mxu0  ;;  %v673_v21 = vpop.f32.mrf.mxu1  ;;  %150 = vadd.xlane.f32.xlu0 %v149_v2 }
  0xf4   :  { %v614_v22 = vadd.f32 %v612_v9, %v605_v20  ;;  %v682_v23 = vadd.f32 %v680_v10, %v673_v21 }
  0xf5   :  { %v1470_v24 = vpop.f32.mrf.mxu0  ;;  %v1478_v25 = vpop.f32.mrf.mxu1 }
  0xf6   :  { %v616_v27 = vmax.f32 %v614_v22, 0.0  ;;  %v684_v28 = vmax.f32 %v682_v23, 0.0 }
  0xf7   :  { %398 = vadd.xlane.f32.xlu0 %v397_v29  ;;  %v1568_v29 = vld [vmem:[#allocation2 + $0x48] sm:$0xff]  }
  0xf8   :  { %v685_v30 = vpack.c.bf16 %v616_v27, %v615_v5  ;;  %v747_v31 = vpack.c.bf16 %v684_v28, %v683_v26  ;;  %v1567_v28 = vld [vmem:[#allocation2 + $0x58] sm:$0xff]  }
  0xfa   :  { %1484 = vmatmul.mubr.msk.bf16.vlgmr.msra.gmra.mxu0 %vm60_vm0, %v685_v30  ;;  %1492 = vmatmul.mubr.msk.bf16.vlgmr.msra.gmra.mxu1 %vm60_vm0, %v747_v31  ;;  %v1569_v30 = vld [vmem:[#allocation2 + $0x50] sm:$0xff]  }
 0x16c   :  { %v270_v34 = vpop.xlane.xlu1 %269 }
 0x16d   :  { %v274_v36 = vmax.f32 %v270_v34, 1.0 }
 0x170   :  { %v273_v38 = vpop.xlane.xlu1 %272 }
 0x171   :  { %v275_v39 = vmax.f32 %v273_v38, 1.0 }
 0x174   :  { %v518_v32 = vpop.xlane.xlu0 %517  ;;  %v402_v63 = vpop.xlane.xlu1 %401 }
 0x175   :  { %v522_v33 = vmax.f32 %v518_v32, 1.0  ;;  %v404_v10 = vmax.f32 %v402_v63, 1.0  ;;  %v1008_v32 = vrot.slane %v1799_v8, %v163_v4 }
 0x177   :  { %1573 = vrcp.f32 %v522_v33 }
 0x178   :  { %v521_v35 = vpop.xlane.xlu0 %520  ;;  %1575 = vrcp.f32 %v274_v36  ;;  %v154_v11 = vpop.xlane.xlu1 %153 }
 0x179   :  { %v523_v37 = vmax.f32 %v521_v35, 1.0 }
 0x17b   :  { %1577 = vrcp.f32 %v523_v37 }
 0x17c   :  { %1579 = vrcp.f32 %v275_v39  ;;  %v901_v39 = vrot.slane %v1799_v8, %v173_v3 }
 0x184   :  { %v1574_v40 = vpop.eup %1573 }
 0x185   :  { %v525_v45 = vmul.f32 %v1574_v40, %v507_v62  ;;  %v1576_v50 = vpop.eup %1575 }
 0x186   :  { %v277_v52 = vmul.f32 %v1576_v50, %v1777_v54  ;;  %v151_v54 = vpop.xlane.xlu0 %150 }
 0x187   :  { %v155_v9 = vmax.f32 %v151_v54, 1.0 }
 0x188   :  { %v1578_v51 = vpop.eup %1577 }
 0x189   :  { %v527_v56 = vmul.f32 %v1578_v51, %v1787_v59  ;;  %v1580_v58 = vpop.eup %1579 }
 0x18a   :  { %v279_v61 = vmul.f32 %v1580_v58, %v1775_v53  ;;  %v399_v62 = vpop.xlane.xlu0 %398  ;;  %v156_v53 = vmax.f32 %v154_v11, 1.0  ;;  %v1572_v11 = vld [vmem:[#allocation2 + $0x60] sm:$0xff]  }
 0x18b   :  { %v403_v59 = vmax.f32 %v399_v62, 1.0 }
 0x18d   :  { %1581 = vrcp.f32 %v403_v59 }
 0x18e   :  { %1583 = vrcp.f32 %v155_v9 }
 0x18f   :  { %1585 = vrcp.f32 %v404_v10  ;;  %v1571_v10 = vld [vmem:[#allocation2 + $0x68] sm:$0xff]  }
 0x190   :  { %1587 = vrcp.f32 %v156_v53  ;;  %v1225_v53 = vrot.slane %v1799_v8, %v302_v6 }
 0x19a   :  { %v1582_v12 = vpop.eup %1581 }
 0x19b   :  { %v406_v14 = vmul.f32 %v1582_v12, %v1794_v0  ;;  %v1584_v19 = vpop.eup %1583 }
 0x19c   :  { %v1586_v20 = vpop.eup %1585  ;;  %v158_v5 = vmul.f32 %v1584_v19, %v1783_v57 }
 0x19d   :  { %v408_v22 = vmul.f32 %v1586_v20, %v1789_v60  ;;  %v1588_v23 = vpop.eup %1587 }
 0x19e   :  { %v160_v27 = vmul.f32 %v1588_v23, %v1779_v55  ;;  %v1570_v55 = vld [vmem:[#allocation2 + $0x40] sm:$0xff]  }
 0x1ba   :  { %v740_v41 = vpop.f32.mrf.mxu0  ;;  %v802_v42 = vpop.f32.mrf.mxu1 }
 0x1bb   :  { %910 = vrot.lane.b32.xlu1 %v802_v42, %s1624_s4 }
 0x1bc   :  { %v1485_v43 = vpop.f32.mrf.mxu0  ;;  %v1493_v44 = vpop.f32.mrf.mxu1 }
 0x1be   :  { %v743_v46 = vpop.f32.mrf.mxu0  ;;  %v805_v47 = vpop.f32.mrf.mxu1 }
 0x1bf   :  { %530 = vrot.lane.b32.xlu1 %v525_v45, %s1625_s8  ;;  %912 = vrot.lane.b32.xlu0 %v805_v47, %s1624_s4 }
 0x1c0   :  { %1495 = vmatprep.subr.mxu0 %v805_v47  ;;  %v1486_v48 = vpop.f32.mrf.mxu0  ;;  %v1494_v49 = vpop.f32.mrf.mxu1 }
 0x1c1   :  { %1496 = vmatpush3.msra.mxu0 %v805_v47 }
 0x1c2   :  { %1497 = vmatprep.subr.mxu0 %v802_v42 }
 0x1c3   :  { %1498 = vmatpush3.msra.mxu0 %v802_v42  ;;  %906 = vrot.lane.b32.xlu0 %v740_v41, %s1624_s4 }
 0x1c4   :  { %908 = vrot.lane.b32.xlu1 %v743_v46, %s1624_s4  ;;  %1499 = vmatprep.subr.mxu0 %v743_v46 }
 0x1c5   :  { %1500 = vmatpush3.msra.mxu0 %v743_v46 }
 0x1c6   :  { %1501 = vmatprep.subr.mxu0 %v740_v41 }
 0x1c7   :  { %1502 = vmatpush3.msra.mxu0 %v740_v41  ;;  %282 = vrot.lane.b32.xlu0 %v277_v52, %s1625_s8 }
 0x1c8   :  { %532 = vrot.lane.b32.xlu1 %v527_v56, %s1625_s8  ;;  %1517 = vmatprep.subr.bf16.mxu0 %v1622_v18 }
 0x1cb   :  { %918 = vrot.lane.b32.xlu0 %v802_v42, %s1620_s21 }
 0x1cc   :  { %284 = vrot.lane.b32.xlu1 %v279_v61, %s1625_s8 }
 0x1cf   :  { %811 = vrot.lane.b32.xlu0 %v740_v41, %s1620_s21 }
 0x1d0   :  { %920 = vrot.lane.b32.xlu1 %v805_v47, %s1620_s21 }
 0x1d4   :  { %813 = vrot.lane.b32.xlu1 %v743_v46, %s1620_s21 }
 0x22d   :  { %v911_v13 = vpop.permute.xlu1 %910 }
 0x231   :  { %v531_v15 = vpop.permute.xlu1 %530  ;;  %v913_v16 = vpop.permute.xlu0 %912 }
 0x232   :  { %v536_v17 = vsel %vm148_vm4, %v406_v14, %v531_v15  ;;  %1506 = vmatprep.subr.mxu1 %v913_v16 }
 0x233   :  { %1507 = vmatpush3.msra.mxu1 %v913_v16  ;;  %1514 = vmatprep.mubr.msk.f32.mxu1 %vm60_vm0, %v536_v17 }
 0x234   :  { %1508 = vmatprep.subr.mxu1 %v911_v13 }
 0x235   :  { %1509 = vmatpush3.msra.mxu1 %v911_v13  ;;  %v907_v2 = vpop.permute.xlu0 %906 }
 0x236   :  { %v909_v21 = vpop.permute.xlu1 %908 }
 0x237   :  { %1510 = vmatprep.subr.mxu1 %v909_v21 }
 0x238   :  { %1511 = vmatpush3.msra.mxu1 %v909_v21 }
 0x239   :  { %1512 = vmatprep.subr.mxu1 %v907_v2  ;;  %v283_v0 = vpop.permute.xlu0 %282 }
 0x23a   :  { %v288_v24 = vsel %vm148_vm4, %v158_v5, %v283_v0  ;;  %1513 = vmatpush3.msra.mxu1 %v907_v2  ;;  %v533_v25 = vpop.permute.xlu1 %532 }
 0x23b   :  { %v537_v26 = vsel %vm148_vm4, %v408_v22, %v533_v25  ;;  %1503 = vmatprep.mubr.msk.f32.mxu0 %vm60_vm0, %v288_v24  ;;  %1525 = vmatprep.subr.bf16.mxu1 %v1622_v18 }
 0x23c   :  { %1515 = vmatmul.mubr.msk.f32.vlgmr.msra.gmra.mxu1 %vm60_vm0, %v537_v26 }
 0x23d   :  { %1529 = vmatprep.mubr.msk.bf16.mxu1 %vm1623_vm3, %v1622_v18  ;;  %1526 = vmatpush3.bf16.msra.mxu1 %v1567_v28  ;;  %v919_v33 = vpop.permute.xlu0 %918 }
 0x23e   :  { %v285_v57 = vpop.permute.xlu1 %284  ;;  %1527 = vmatprep.subr.bf16.mxu1 %v1622_v18 }
 0x23f   :  { %v289_v60 = vsel %vm148_vm4, %v160_v27, %v285_v57 }
 0x240   :  { %1504 = vmatmul.mubr.msk.f32.vlgmr.msra.gmra.mxu0 %vm60_vm0, %v289_v60 }
 0x241   :  { %1521 = vmatprep.mubr.msk.bf16.mxu0 %vm1623_vm3, %v1622_v18  ;;  %1518 = vmatpush3.bf16.msra.mxu0 %v1568_v29  ;;  %v812_v44 = vpop.permute.xlu0 %811 }
 0x242   :  { %1528 = vmatpush3.bf16.msra.mxu1 %v1569_v30  ;;  %1519 = vmatprep.subr.bf16.mxu0 %v1622_v18  ;;  %v921_v31 = vpop.permute.xlu1 %920 }
 0x243   :  { %1544 = vmatprep.subr.bf16.mxu1 %v1622_v18 }
 0x245   :  { %1520 = vmatpush3.bf16.msra.mxu0 %v1570_v55 }
 0x246   :  { %v814_v40 = vpop.permute.xlu1 %813 }
 0x2fc   :  { %v1516_v34 = vpop.f32.mrf.mxu1 }
 0x2fd   :  { %v1002_v35 = vadd.f32 %v1516_v34, %v921_v31 }
 0x2fe   :  { %v996_v36 = vpop.f32.mrf.mxu1 }
 0x2ff   :  { %v1010_v37 = vadd.f32 %v1008_v32, %v1002_v35  ;;  %v997_v38 = vadd.f32 %v996_v36, %v919_v33 }
 0x300   :  { %v1505_v41 = vpop.f32.mrf.mxu0 }
 0x301   :  { %v1009_v42 = vadd.f32 %v1008_v32, %v997_v38  ;;  %v895_v43 = vadd.f32 %v1505_v41, %v814_v40  ;;  %v1014_v46 = vmax.f32 %v1010_v37, 0.0 }
 0x302   :  { %v889_v45 = vpop.f32.mrf.mxu0 }
 0x303   :  { %v1013_v47 = vmax.f32 %v1009_v42, 0.0  ;;  %v903_v48 = vadd.f32 %v901_v39, %v895_v43  ;;  %v890_v4 = vadd.f32 %v889_v45, %v812_v44 }
 0x305   :  { %v1077_v49 = vpack.c.bf16 %v1014_v46, %v1013_v47  ;;  %v902_v50 = vadd.f32 %v901_v39, %v890_v4  ;;  %v1012_v51 = vmax.f32 %v903_v48, 0.0 }
 0x307   :  { %v1011_v52 = vmax.f32 %v902_v50, 0.0  ;;  %1530 = vmatmul.mubr.msk.bf16.vlgmr.msra.gmra.mxu1 %vm60_vm0, %v1077_v49 }
 0x308   :  { %1548 = vmatprep.mubr.msk.bf16.mxu1 %vm1623_vm3, %v1622_v18  ;;  %1545 = vmatpush3.bf16.msra.mxu1 %v1571_v10 }
 0x309   :  { %v1015_v3 = vpack.c.bf16 %v1012_v51, %v1011_v52  ;;  %1546 = vmatprep.subr.bf16.mxu1 %v1622_v18  ;;  %v1239_v18 = vrot.slane %v1799_v8, %v421_v7 }
 0x30b   :  { %1522 = vmatmul.mubr.msk.bf16.vlgmr.msra.gmra.mxu0 %vm60_vm0, %v1015_v3 }
 0x30c   :  { %1541 = vmatprep.mubr.msk.f32.mxu0 %vm60_vm0, %v288_v24  ;;  %1547 = vmatpush3.bf16.msra.mxu1 %v1572_v11 }
 0x3c7   :  { %v1132_v56 = vpop.f32.mrf.mxu1 }
 0x3c9   :  { %v1531_v58 = vpop.f32.mrf.mxu1 }
 0x3cb   :  { %v1070_v61 = vpop.f32.mrf.mxu0  ;;  %v1135_v54 = vpop.f32.mrf.mxu1 }
 0x3cc   :  { %1533 = vmatprep.subr.mxu0 %v1135_v54  ;;  %1141 = vrot.lane.b32.xlu0 %v1070_v61, %s1620_s21 }
 0x3cd   :  { %v1523_v62 = vpop.f32.mrf.mxu0  ;;  %v1532_v59 = vpop.f32.mrf.mxu1  ;;  %1534 = vmatpush3.msra.mxu0 %v1135_v54 }
 0x3ce   :  { %1535 = vmatprep.subr.mxu0 %v1132_v56 }
 0x3cf   :  { %v1073_v63 = vpop.f32.mrf.mxu0  ;;  %1536 = vmatpush3.msra.mxu0 %v1132_v56 }
 0x3d0   :  { %1143 = vrot.lane.b32.xlu1 %v1073_v63, %s1620_s21  ;;  %1537 = vmatprep.subr.mxu0 %v1073_v63 }
 0x3d1   :  { %v1524_v9 = vpop.f32.mrf.mxu0  ;;  %1538 = vmatpush3.msra.mxu0 %v1073_v63 }
 0x3d2   :  { %1539 = vmatprep.subr.mxu0 %v1070_v61 }
 0x3d3   :  { %1540 = vmatpush3.msra.mxu0 %v1070_v61 }
 0x3d4   :  { %1542 = vmatmul.mubr.msk.f32.vlgmr.msra.gmra.mxu0 %vm60_vm0, %v289_v60 }
 0x43e   :  { %v1142_v15 = vpop.permute.xlu0 %1141 }
 0x442   :  { %v1144_v12 = vpop.permute.xlu1 %1143 }
 0x494   :  { %v1543_v13 = vpop.f32.mrf.mxu0 }
 0x495   :  { %v1219_v14 = vadd.f32 %v1543_v13, %v1144_v12 }
 0x496   :  { %v1213_v16 = vpop.f32.mrf.mxu0 }
 0x497   :  { %v1227_v17 = vadd.f32 %v1225_v53, %v1219_v14  ;;  %v1214_v19 = vadd.f32 %v1213_v16, %v1142_v15 }
 0x499   :  { %v1226_v2 = vadd.f32 %v1225_v53, %v1214_v19  ;;  %v1229_v20 = vmax.f32 %v1227_v17, 0.0 }
 0x49b   :  { %v1228_v21 = vmax.f32 %v1226_v2, 0.0 }
 0x49d   :  { %v1230_v5 = vpack.c.bf16 %v1229_v20, %v1228_v21 }
 0x49f   :  { %1549 = vmatmul.mubr.msk.bf16.vlgmr.msra.gmra.mxu1 %vm60_vm0, %v1230_v5 }
 0x55f   :  { %v1289_v0 = vpop.f32.mrf.mxu1 }
 0x560   :  { %v1290_v22 = vadd.f32 %v1289_v0, %v1239_v18 }
 0x561   :  { %v1550_v6 = vpop.f32.mrf.mxu1 }
 0x562   :  { %1296 = vmax.xlane.f32.xlu0 %v1290_v22 }
 0x563   :  { %v1292_v23 = vpop.f32.mrf.mxu1 }
 0x564   :  { %v1293_v24 = vadd.f32 %v1292_v23, %v1239_v18 }
 0x565   :  { %v1551_v25 = vpop.f32.mrf.mxu1 }
 0x566   :  { %1298 = vmax.xlane.f32.xlu1 %v1293_v24 }
 0x5eb   :  { %v1297_v26 = vpop.xlane.xlu0 %1296 }
 0x5ec   :  { %v1300_v27 = vsub.f32 %v1290_v22, %v1297_v26 }
 0x5ee   :  { %v1302_v57 = vmul.f32 1.442695, %v1300_v27 }
 0x5ef   :  { %v1299_v60 = vpop.xlane.xlu1 %1298 }
 0x5f0   :  { %1589 = vpow2.f32 %v1302_v57  ;;  %v1301_v28 = vsub.f32 %v1293_v24, %v1299_v60 }
 0x5f2   :  { %v1304_v29 = vmul.f32 1.442695, %v1301_v28 }
 0x5f4   :  { %1591 = vpow2.f32 %v1304_v29 }
 0x5fd   :  { %v1590_v30 = vpop.eup %1589 }
 0x5fe   :  { %1306 = vadd.xlane.f32.xlu0 %v1590_v30 }
 0x601   :  { %v1592_v1 = vpop.eup %1591 }
 0x602   :  { %1308 = vadd.xlane.f32.xlu0 %v1592_v1 }
 0x687   :  { %v1307_v7 = vpop.xlane.xlu0 %1306 }
 0x688   :  { %1593 = vrcp.f32 %v1307_v7 }
 0x68b   :  { %v1309_v8 = vpop.xlane.xlu0 %1308 }
 0x68c   :  { %1595 = vrcp.f32 %v1309_v8 }
 0x695   :  { %v1594_v55 = vpop.eup %1593 }
 0x696   :  { %v1312_v31 = vmul.f32 %v1594_v55, %v1590_v30 }
 0x698   :  { %1314 = vst [vmem:[%s1878_s5] sm:$0xff] %v1312_v31 }
 0x699   :  { %v1596_v32 = vpop.eup %1595 }
 0x69a   :  { %v1313_v33 = vmul.f32 %v1596_v32, %v1592_v1 }
 0x69c   :  { %1315 = vst [vmem:[%s1878_s5 + $0x8] sm:$0xff] %v1313_v33 }
 0x69d   :  { %1320 = vsyncpa [#allocation3], 1 }

</bundles_post_ra>
